<compile_context>
chip_gen: v7x
topology: tpu7x:2x2x1
jax: 0.10.0
libtpu: 0.0.40
codegen_flags: <defaults>
</compile_context>

<pallas_src>
import functools
import math

import jax
import jax.numpy as jnp
from jax.experimental import pallas as pl
from jax.experimental.pallas import tpu as pltpu

# ---- problem sizes (small, consistent with the module's forward) ----
N = 2          # batch
LQ = 8         # query length
LK = 8         # key/value length
D = 32         # att_dim
NUM_HEADS = 4  # att_head
HEAD_DIM = D // NUM_HEADS


def _self_attention_kernel(x_ref, w_ref, b_ref, ln_ref, mask_ref, o_ref, *,
                           n, lq, lk, d, num_heads, head_dim):
    nlq = n * lq
    nlk = n * lk

    x = x_ref[...]                                        # (nlq + 2*nlk, d)

    # Single fused Q|K|V projection on the MXU: (R, d) @ (d, 3d) + bias.
    # (Off-diagonal blocks of the result are never read, so adding the fused
    # bias to every row is harmless.)
    y = jnp.dot(x, w_ref[...], preferred_element_type=jnp.float32) + b_ref[...]

    q_rows = y[0:nlq, 0:d]                                # (nlq, d)  query proj
    k_rows = y[nlq:nlq + nlk, d:2 * d]                    # (nlk, d)  key proj
    v_rows = y[nlq + nlk:nlq + 2 * nlk, 2 * d:3 * d]      # (nlk, d)  value proj

    # Head-batched tensors: heads become the leading batch dim of two batched
    # matmuls instead of 2*H unrolled (8,8)@(8,8) micro-matmuls + lane concat.
    qh = jnp.stack([q_rows[:, h * head_dim:(h + 1) * head_dim]
                    for h in range(num_heads)], axis=0)   # (H, nlq, hd)
    kh = jnp.stack([k_rows[:, h * head_dim:(h + 1) * head_dim]
                    for h in range(num_heads)], axis=0)   # (H, nlk, hd)
    vh = jnp.stack([v_rows[:, h * head_dim:(h + 1) * head_dim]
                    for h in range(num_heads)], axis=0)   # (H, nlk, hd)

    inv_sqrt_d = 1.0 / math.sqrt(head_dim)
    scores = jnp.einsum('hqd,hkd->hqk', qh, kh,
                        preferred_element_type=jnp.float32) * inv_sqrt_d
    # Additive mask (-1e30 across different batch examples): batch rides in the
    # row axis so the whole batch is covered by one pair of batched matmuls.
    scores = scores + mask_ref[...][None, :, :]

    # Numerically-stable softmax; divide goes to the EUP (otherwise idle) with
    # one Newton step to polish the approximate reciprocal back to ~f32.
    scores = scores - jnp.max(scores, axis=-1, keepdims=True)
    e = jnp.exp(scores)
    denom = jnp.sum(e, axis=-1, keepdims=True)
    r = pl.reciprocal(denom, approx=True)
    r = r * (2.0 - denom * r)
    probs = e * r
    # TODO(synk): nn.Dropout(0.1) on attention_probs is identity in eval mode; omitted.

    ctx_h = jnp.einsum('hqk,hkd->hqd', probs, vh,
                       preferred_element_type=jnp.float32)          # (H, nlq, hd)
    ctx = jnp.concatenate([ctx_h[h] for h in range(num_heads)], axis=-1)  # (nlq, d)

    # Residual add (context_layer += query_states) then LayerNorm(eps=1e-6).
    resid = x[0:nlq, :]
    z = ctx + resid
    mean = jnp.mean(z, axis=-1, keepdims=True)
    var = jnp.mean((z - mean) ** 2, axis=-1, keepdims=True)
    z_norm = (z - mean) * jax.lax.rsqrt(var + 1e-6)

    ln = ln_ref[...]                                      # (2, d): [gamma; beta]
    o_ref[...] = z_norm * ln[0:1, :] + ln[1:2, :]


def self_attention_pallas(query_states, key_states, value_states, params):
    """query_states: (N, LQ, D); key_states/value_states: (N, LK, D)."""
    n, lq, d = query_states.shape
    _, lk, _ = key_states.shape
    num_heads = NUM_HEADS
    head_dim = d // num_heads

    # Fused projection weight/bias (PyTorch Linear weights are (out, in)).
    w_all = jnp.concatenate([params["wq"].T, params["wk"].T, params["wv"].T],
                            axis=1)                                        # (d, 3d)
    b_all = jnp.concatenate([params["bq"], params["bk"], params["bv"]]
                            ).reshape(1, 3 * d)                            # (1, 3d)
    ln = jnp.stack([params["gamma"], params["beta"]], axis=0)              # (2, d)

    # Row-stack q/k/v so the fused projection is one matmul over all of them.
    x_all = jnp.concatenate([
        query_states.reshape(n * lq, d),
        key_states.reshape(n * lk, d),
        value_states.reshape(n * lk, d),
    ], axis=0)                                                             # (n*lq+2*n*lk, d)

    # Additive mask: 0 within the same batch example, -1e30 across examples.
    row_b = jnp.repeat(jnp.arange(n), lq)
    col_b = jnp.repeat(jnp.arange(n), lk)
    neg_mask = jnp.where(row_b[:, None] == col_b[None, :],
                         0.0, -1e30).astype(jnp.float32)                   # (n*lq, n*lk)

    kernel = functools.partial(
        _self_attention_kernel,
        n=n, lq=lq, lk=lk, d=d, num_heads=num_heads, head_dim=head_dim)

    vmem_spec = pl.BlockSpec(memory_space=pltpu.MemorySpace.VMEM)
    out_flat = pl.pallas_call(
        kernel,
        out_shape=jax.ShapeDtypeStruct((n * lq, d), jnp.float32),
        in_specs=[vmem_spec] * 5,
        out_specs=vmem_spec,
    )(x_all, w_all, b_all, ln, neg_mask)
    return out_flat.reshape(n, lq, d)


def reference_jax(query_states, key_states, value_states, params):
    """Plain-JAX reference mirroring the PyTorch forward (eval mode)."""
    def linear(x, w, b):
        return jnp.einsum("nld,od->nlo", x, w) + b

    def split_heads(x):
        n, l, _ = x.shape
        return x.reshape(n, l, NUM_HEADS, HEAD_DIM).transpose(0, 2, 1, 3)

    q = split_heads(linear(query_states, params["wq"], params["bq"]))
    k = split_heads(linear(key_states, params["wk"], params["bk"]))
    v = split_heads(linear(value_states, params["wv"], params["bv"]))
    scores = jnp.einsum("nhqd,nhkd->nhqk", q, k) / math.sqrt(HEAD_DIM)
    probs = jax.nn.softmax(scores, axis=-1)
    ctx = jnp.einsum("nhqk,nhkd->nhqd", probs, v)
    ctx = ctx.transpose(0, 2, 1, 3).reshape(query_states.shape)
    y = ctx + query_states
    mean = jnp.mean(y, axis=-1, keepdims=True)
    var = jnp.mean((y - mean) ** 2, axis=-1, keepdims=True)
    y = (y - mean) / jnp.sqrt(var + 1e-6)
    return y * params["gamma"] + params["beta"]


if __name__ == "__main__":
    key = jax.random.PRNGKey(0)
    keys = jax.random.split(key, 9)

    # Deterministic synthetic parameters (PyTorch Linear weight shape: (out, in)).
    scale = 1.0 / math.sqrt(D)
    params = {
        "wq": jax.random.normal(keys[0], (D, D), jnp.float32) * scale,
        "bq": jax.random.normal(keys[1], (D,), jnp.float32) * 0.01,
        "wk": jax.random.normal(keys[2], (D, D), jnp.float32) * scale,
        "bk": jax.random.normal(keys[3], (D,), jnp.float32) * 0.01,
        "wv": jax.random.normal(keys[4], (D, D), jnp.float32) * scale,
        "bv": jax.random.normal(keys[5], (D,), jnp.float32) * 0.01,
        "gamma": jnp.ones((D,), jnp.float32),
        "beta": jnp.zeros((D,), jnp.float32),
    }

    query_states = jax.random.normal(keys[6], (N, LQ, D), jnp.float32)
    key_states = jax.random.normal(keys[7], (N, LK, D), jnp.float32)
    value_states = jax.random.normal(keys[8], (N, LK, D), jnp.float32)

    out = self_attention_pallas(query_states, key_states, value_states, params)
    out = jax.block_until_ready(out)

    ref = reference_jax(query_states, key_states, value_states, params)
    assert out.shape == (N, LQ, D)
    # Tolerance slightly relaxed vs. pure-f32 to accommodate the EUP
    # approximate-reciprocal + Newton-step softmax normalization.
    assert jnp.allclose(out, ref, atol=1e-3, rtol=1e-3), "mismatch vs reference"

    print("KERNEL_OK")
</pallas_src>

<mosaic_0001>
module attributes {stable_mosaic.version = 11 : i64} {
  func.func @_self_attention_kernel(%arg0: memref<48x32xf32, #tpu.memory_space<vmem>>, %arg1: memref<32x96xf32, #tpu.memory_space<vmem>>, %arg2: memref<1x96xf32, #tpu.memory_space<vmem>>, %arg3: memref<2x32xf32, #tpu.memory_space<vmem>>, %arg4: memref<16x16xf32, #tpu.memory_space<vmem>>, %arg5: memref<16x32xf32, #tpu.memory_space<vmem>>) attributes {dimension_semantics = [], scalar_prefetch = 0 : i64, scratch_operands = 0 : i64, tpu.core_type = #tpu.core_type<tc>} {
    %c0 = arith.constant 0 : index
    %c0_0 = arith.constant 0 : index
    %0 = vector.load %arg0[%c0, %c0_0] : memref<48x32xf32, #tpu.memory_space<vmem>>, vector<48x32xf32>
    %c0_1 = arith.constant 0 : index
    %c0_2 = arith.constant 0 : index
    %1 = vector.load %arg1[%c0_1, %c0_2] : memref<32x96xf32, #tpu.memory_space<vmem>>, vector<32x96xf32>
    %cst = arith.constant dense<0.000000e+00> : vector<48x96xf32>
    %2 = tpu.matmul %0, %1, %cst {dimension_numbers = #tpu.dot_dimension_numbers<[1], [0], [0], [1], [0, 0, 1, 1], [], []>} : vector<48x32xf32>, vector<32x96xf32>, vector<48x96xf32> -> vector<48x96xf32>
    %c0_3 = arith.constant 0 : index
    %c0_4 = arith.constant 0 : index
    %3 = vector.load %arg2[%c0_3, %c0_4] : memref<1x96xf32, #tpu.memory_space<vmem>>, vector<1x96xf32>
    %4 = vector.broadcast %3 : vector<1x96xf32> to vector<48x96xf32>
    %5 = arith.addf %2, %4 : vector<48x96xf32>
    %6 = vector.extract_strided_slice %5 {offsets = [0, 0], sizes = [16, 32], strides = [1, 1]} : vector<48x96xf32> to vector<16x32xf32>
    %7 = vector.extract_strided_slice %5 {offsets = [16, 32], sizes = [16, 32], strides = [1, 1]} : vector<48x96xf32> to vector<16x32xf32>
    %8 = vector.extract_strided_slice %5 {offsets = [32, 64], sizes = [16, 32], strides = [1, 1]} : vector<48x96xf32> to vector<16x32xf32>
    %9 = vector.extract_strided_slice %6 {offsets = [0, 0], sizes = [16, 8], strides = [1, 1]} : vector<16x32xf32> to vector<16x8xf32>
    %10 = vector.extract_strided_slice %6 {offsets = [0, 8], sizes = [16, 8], strides = [1, 1]} : vector<16x32xf32> to vector<16x8xf32>
    %11 = vector.extract_strided_slice %6 {offsets = [0, 16], sizes = [16, 8], strides = [1, 1]} : vector<16x32xf32> to vector<16x8xf32>
    %12 = vector.extract_strided_slice %6 {offsets = [0, 24], sizes = [16, 8], strides = [1, 1]} : vector<16x32xf32> to vector<16x8xf32>
    %13 = vector.shape_cast %9 : vector<16x8xf32> to vector<1x16x8xf32>
    %14 = vector.shape_cast %10 : vector<16x8xf32> to vector<1x16x8xf32>
    %15 = vector.shape_cast %11 : vector<16x8xf32> to vector<1x16x8xf32>
    %16 = vector.shape_cast %12 : vector<16x8xf32> to vector<1x16x8xf32>
    %17 = tpu.concatenate %13, %14, %15, %16 in 0 : vector<1x16x8xf32>, vector<1x16x8xf32>, vector<1x16x8xf32>, vector<1x16x8xf32> -> vector<4x16x8xf32>
    %18 = vector.extract_strided_slice %7 {offsets = [0, 0], sizes = [16, 8], strides = [1, 1]} : vector<16x32xf32> to vector<16x8xf32>
    %19 = vector.extract_strided_slice %7 {offsets = [0, 8], sizes = [16, 8], strides = [1, 1]} : vector<16x32xf32> to vector<16x8xf32>
    %20 = vector.extract_strided_slice %7 {offsets = [0, 16], sizes = [16, 8], strides = [1, 1]} : vector<16x32xf32> to vector<16x8xf32>
    %21 = vector.extract_strided_slice %7 {offsets = [0, 24], sizes = [16, 8], strides = [1, 1]} : vector<16x32xf32> to vector<16x8xf32>
    %22 = vector.shape_cast %18 : vector<16x8xf32> to vector<1x16x8xf32>
    %23 = vector.shape_cast %19 : vector<16x8xf32> to vector<1x16x8xf32>
    %24 = vector.shape_cast %20 : vector<16x8xf32> to vector<1x16x8xf32>
    %25 = vector.shape_cast %21 : vector<16x8xf32> to vector<1x16x8xf32>
    %26 = tpu.concatenate %22, %23, %24, %25 in 0 : vector<1x16x8xf32>, vector<1x16x8xf32>, vector<1x16x8xf32>, vector<1x16x8xf32> -> vector<4x16x8xf32>
    %27 = vector.extract_strided_slice %8 {offsets = [0, 0], sizes = [16, 8], strides = [1, 1]} : vector<16x32xf32> to vector<16x8xf32>
    %28 = vector.extract_strided_slice %8 {offsets = [0, 8], sizes = [16, 8], strides = [1, 1]} : vector<16x32xf32> to vector<16x8xf32>
    %29 = vector.extract_strided_slice %8 {offsets = [0, 16], sizes = [16, 8], strides = [1, 1]} : vector<16x32xf32> to vector<16x8xf32>
    %30 = vector.extract_strided_slice %8 {offsets = [0, 24], sizes = [16, 8], strides = [1, 1]} : vector<16x32xf32> to vector<16x8xf32>
    %31 = vector.shape_cast %27 : vector<16x8xf32> to vector<1x16x8xf32>
    %32 = vector.shape_cast %28 : vector<16x8xf32> to vector<1x16x8xf32>
    %33 = vector.shape_cast %29 : vector<16x8xf32> to vector<1x16x8xf32>
    %34 = vector.shape_cast %30 : vector<16x8xf32> to vector<1x16x8xf32>
    %35 = tpu.concatenate %31, %32, %33, %34 in 0 : vector<1x16x8xf32>, vector<1x16x8xf32>, vector<1x16x8xf32>, vector<1x16x8xf32> -> vector<4x16x8xf32>
    "tpu.trace_start"() <{level = 10 : i32, message = "hqd,hkd->hqk"}> : () -> ()
    %cst_5 = arith.constant dense<0.000000e+00> : vector<4x16x16xf32>
    %36 = tpu.matmul %17, %26, %cst_5 {dimension_numbers = #tpu.dot_dimension_numbers<[2], [2], [1], [1], [0, 0, 0, 1, 1, 1], [0], [0]>} : vector<4x16x8xf32>, vector<4x16x8xf32>, vector<4x16x16xf32> -> vector<4x16x16xf32>
    "tpu.trace_stop"() : () -> ()
    %cst_6 = arith.constant 0.353553385 : f32
    %37 = vector.broadcast %cst_6 : f32 to vector<4x16x16xf32>
    %38 = arith.mulf %36, %37 : vector<4x16x16xf32>
    %c0_7 = arith.constant 0 : index
    %c0_8 = arith.constant 0 : index
    %39 = vector.load %arg4[%c0_7, %c0_8] : memref<16x16xf32, #tpu.memory_space<vmem>>, vector<16x16xf32>
    %40 = vector.shape_cast %39 : vector<16x16xf32> to vector<1x16x16xf32>
    %41 = vector.broadcast %40 : vector<1x16x16xf32> to vector<4x16x16xf32>
    %42 = arith.addf %38, %41 : vector<4x16x16xf32>
    %cst_9 = arith.constant dense<0xFF800000> : vector<4x16xf32>
    %43 = vector.multi_reduction <maximumf>, %42, %cst_9 [2] : vector<4x16x16xf32> to vector<4x16xf32>
    %44 = vector.shape_cast %43 : vector<4x16xf32> to vector<4x16x1xf32>
    %45 = vector.broadcast %44 : vector<4x16x1xf32> to vector<4x16x16xf32>
    %46 = arith.subf %42, %45 : vector<4x16x16xf32>
    %47 = math.exp %46 : vector<4x16x16xf32>
    %cst_10 = arith.constant dense<0.000000e+00> : vector<4x16xf32>
    %48 = vector.multi_reduction <add>, %47, %cst_10 [2] : vector<4x16x16xf32> to vector<4x16xf32>
    %49 = vector.shape_cast %48 : vector<4x16xf32> to vector<4x16x1xf32>
    %50 = tpu.reciprocal %49 {approx = true} : vector<4x16x1xf32> -> vector<4x16x1xf32>
    %51 = arith.mulf %49, %50 : vector<4x16x1xf32>
    %cst_11 = arith.constant 2.000000e+00 : f32
    %52 = vector.broadcast %cst_11 : f32 to vector<4x16x1xf32>
    %53 = arith.subf %52, %51 : vector<4x16x1xf32>
    %54 = arith.mulf %50, %53 : vector<4x16x1xf32>
    %55 = vector.broadcast %54 : vector<4x16x1xf32> to vector<4x16x16xf32>
    %56 = arith.mulf %47, %55 : vector<4x16x16xf32>
    "tpu.trace_start"() <{level = 10 : i32, message = "hqk,hkd->hqd"}> : () -> ()
    %cst_12 = arith.constant dense<0.000000e+00> : vector<4x16x8xf32>
    %57 = tpu.matmul %56, %35, %cst_12 {dimension_numbers = #tpu.dot_dimension_numbers<[2], [1], [1], [2], [0, 0, 0, 1, 1, 2], [0], [0]>} : vector<4x16x16xf32>, vector<4x16x8xf32>, vector<4x16x8xf32> -> vector<4x16x8xf32>
    "tpu.trace_stop"() : () -> ()
    %58 = vector.extract_strided_slice %57 {offsets = [0, 0, 0], sizes = [1, 16, 8], strides = [1, 1, 1]} : vector<4x16x8xf32> to vector<1x16x8xf32>
    %59 = vector.shape_cast %58 : vector<1x16x8xf32> to vector<16x8xf32>
    %60 = vector.extract_strided_slice %57 {offsets = [1, 0, 0], sizes = [1, 16, 8], strides = [1, 1, 1]} : vector<4x16x8xf32> to vector<1x16x8xf32>
    %61 = vector.shape_cast %60 : vector<1x16x8xf32> to vector<16x8xf32>
    %62 = vector.extract_strided_slice %57 {offsets = [2, 0, 0], sizes = [1, 16, 8], strides = [1, 1, 1]} : vector<4x16x8xf32> to vector<1x16x8xf32>
    %63 = vector.shape_cast %62 : vector<1x16x8xf32> to vector<16x8xf32>
    %64 = vector.extract_strided_slice %57 {offsets = [3, 0, 0], sizes = [1, 16, 8], strides = [1, 1, 1]} : vector<4x16x8xf32> to vector<1x16x8xf32>
    %65 = vector.shape_cast %64 : vector<1x16x8xf32> to vector<16x8xf32>
    %66 = tpu.concatenate %59, %61, %63, %65 in 1 : vector<16x8xf32>, vector<16x8xf32>, vector<16x8xf32>, vector<16x8xf32> -> vector<16x32xf32>
    %67 = vector.extract_strided_slice %0 {offsets = [0, 0], sizes = [16, 32], strides = [1, 1]} : vector<48x32xf32> to vector<16x32xf32>
    %68 = arith.addf %66, %67 : vector<16x32xf32>
    %cst_13 = arith.constant dense<0.000000e+00> : vector<16xf32>
    %69 = vector.multi_reduction <add>, %68, %cst_13 [1] : vector<16x32xf32> to vector<16xf32>
    %70 = vector.shape_cast %69 : vector<16xf32> to vector<16x1xf32>
    %cst_14 = arith.constant 3.200000e+01 : f32
    %71 = vector.broadcast %cst_14 : f32 to vector<16x1xf32>
    %72 = arith.divf %70, %71 : vector<16x1xf32>
    %73 = vector.broadcast %72 : vector<16x1xf32> to vector<16x32xf32>
    %74 = arith.subf %68, %73 : vector<16x32xf32>
    %75 = arith.mulf %74, %74 : vector<16x32xf32>
    %cst_15 = arith.constant dense<0.000000e+00> : vector<16xf32>
    %76 = vector.multi_reduction <add>, %75, %cst_15 [1] : vector<16x32xf32> to vector<16xf32>
    %77 = vector.shape_cast %76 : vector<16xf32> to vector<16x1xf32>
    %cst_16 = arith.constant 3.200000e+01 : f32
    %78 = vector.broadcast %cst_16 : f32 to vector<16x1xf32>
    %79 = arith.divf %77, %78 : vector<16x1xf32>
    %80 = vector.broadcast %72 : vector<16x1xf32> to vector<16x32xf32>
    %81 = arith.subf %68, %80 : vector<16x32xf32>
    %cst_17 = arith.constant 9.99999997E-7 : f32
    %82 = vector.broadcast %cst_17 : f32 to vector<16x1xf32>
    %83 = arith.addf %79, %82 : vector<16x1xf32>
    %84 = math.rsqrt %83 : vector<16x1xf32>
    %85 = vector.broadcast %84 : vector<16x1xf32> to vector<16x32xf32>
    %86 = arith.mulf %81, %85 : vector<16x32xf32>
    %c0_18 = arith.constant 0 : index
    %c0_19 = arith.constant 0 : index
    %87 = vector.load %arg3[%c0_18, %c0_19] : memref<2x32xf32, #tpu.memory_space<vmem>>, vector<2x32xf32>
    %88 = vector.extract_strided_slice %87 {offsets = [0, 0], sizes = [1, 32], strides = [1, 1]} : vector<2x32xf32> to vector<1x32xf32>
    %89 = vector.broadcast %88 : vector<1x32xf32> to vector<16x32xf32>
    %90 = arith.mulf %86, %89 : vector<16x32xf32>
    %91 = vector.extract_strided_slice %87 {offsets = [1, 0], sizes = [1, 32], strides = [1, 1]} : vector<2x32xf32> to vector<1x32xf32>
    %92 = vector.broadcast %91 : vector<1x32xf32> to vector<16x32xf32>
    %93 = arith.addf %90, %92 : vector<16x32xf32>
    %c0_20 = arith.constant 0 : index
    %c0_21 = arith.constant 0 : index
    %94 = vector.load %arg5[%c0_20, %c0_21] : memref<16x32xf32, #tpu.memory_space<vmem>>, vector<16x32xf32>
    tpu.vector_store %arg5[%c0_20, %c0_21], %93 {strides = array<i32>} : memref<16x32xf32, #tpu.memory_space<vmem>>, vector<16x32xf32>,
    return
  }
}

</mosaic_0001>

<bundles_post_ra>
// kernel: tpu_custom_call.1
= control target key start
LH: loop header
LB: loop body
LE: loop exit
PB: predicated region body
PF: predicated region fallthrough
CT: control target
= control target key end

     0   :  { %vm38_vm0 = vcmask 261120   ;;  %s1682_s0 = inlined_call_operand.vmem [shape: f32[48,32], index: 0, kind: input, shape index: {}]   ;;  %s1683_s1 = inlined_call_operand.vmem [shape: f32[32,96], index: 1, kind: input, shape index: {}]   ;;  %s1684_s2 = inlined_call_operand.vmem [shape: f32[1,96], index: 2, kind: input, shape index: {}]   ;;  %s1685_s3 = inlined_call_operand.vmem [shape: f32[2,32], index: 3, kind: input, shape index: {}]   ;;  %s1686_s4 = inlined_call_operand.vmem [shape: f32[16,16], index: 4, kind: input, shape index: {}]   ;;  %s1687_s5 = inlined_call_operand.hbm [shape: f32[16,32], index: 5, kind: output, shape index: {}]  }
   0x1   :  { %v27_v0 = vld [vmem:[%s1683_s1] sm:$0xff]  ;;  %v28_v1 = vld [vmem:[%s1683_s1 + $0x8] sm:$0xff]  ;;  %v29_v2 = vld [vmem:[%s1683_s1 + $0x10] sm:$0xff] }
   0x2   :  { %v1259_v3 = vpack.c.bf16 %v28_v1, %v27_v0  ;;  %v30_v4 = vld [vmem:[%s1683_s1 + $0x18] sm:$0xff]  ;;  %v1502_v5 = vld [vmem:[%s1682_s0] sm:$0xff] }
   0x3   :  { %v1263_v6 = vpack.c.bf16 %v30_v4, %v29_v2  ;;  %1194 = vmatprep.mubr.msk.f32.mxu0 %vm38_vm0, %v1502_v5 }
   0x4   :  { %10 = vsyncpa [#allocation3], 0  ;;  %1260 = vmatprep.subr.bf16.mxu0 %v1259_v3  ;;  %v1509_v7 = vld [vmem:[%s1682_s0 + $0x8] sm:$0xff]  ;;  %v23_v8 = vld [vmem:[%s1682_s0 + $0x10] sm:$0xff]  ;;  %vm198_vm1 = vcmask 64512   ;;  %s1447_s10 = smov 104  }
   0x5   :  { %1262 = vmatpush3.bf16.msra.mxu0 %v1259_v3  ;;  %v24_v9 = vld [vmem:[%s1682_s0 + $0x18] sm:$0xff]  ;;  %v1524_v10 = vld [vmem:[%s1684_s2] ss:$0 sm:$0xff]  ;;  %s1448_s11 = smov 120   ;;  %s1449_s2 = smov 96   ;;  %v26_v22 = vld [vmem:[%s1682_s0 + $0x28] sm:$0xff] }
   0x6   :  { %1264 = vmatprep.subr.bf16.mxu0 %v1263_v6  ;;  %s1450_s12 = smov 112   ;;  %v25_v21 = vld [vmem:[%s1682_s0 + $0x20] sm:$0xff]  ;;  %vm1543_vm2 = vmpackc.low %vm198_vm1, %vm198_vm1  ;;  %v552_v54 = vld [vmem:[%s1686_s4 + $0x8] sm:$0xff]  ;;  %vm561_vm3 = vcmask 130048   ;;  %s1452_s20 = smov 8   ;;  %vm1050_vm4 = vcmask 195584  }
   0x7   :  { %v551_v57 = vld [vmem:[%s1686_s4] sm:$0xff]  ;;  %s1451_s4 = smov 64   ;;  %s1453_s21 = smov 16  }
   0x8   :  { %s1454_s22 = smov 24   ;;  %s1455_s25 = smov [#allocation2]  }
   0x9   :  { %1266 = vmatpush3.bf16.msra.mxu0 %v1263_v6  ;;  %s1102_s26 = sshll.u32 %s1455_s25, 4  ;;  %s1103_s26 = int_to_ptr.vmem [resolvable:$true] %s1102_s26 }
   0xa   :  { %s1423_s27 = scalar_lea.vmem %s1103_s26, 256  ;;  %p1428_p1 = scmp.lt.s32.totalorder %s1103_s26, %s1103_s26 }
   0xb   :  { %p1424_p0 = scmp.ne.s32.totalorder %s1103_s26, %s1423_s27  ;;  %p1429_p2 = scmp.lt.s32.totalorder %s1423_s27, %s1423_s27 }
   0xc   :  { %1195 = vmatmul.mubr.msk.f32.vlgmr.msra.gmra.mrb[0].mxu0 %vm38_vm0, %v1509_v7 }
   0xd   :  { %1197 = vmatprep.mubr.msk.f32.mxu0 %vm38_vm0, %v23_v8  ;;  %p1430_p3 = por %p1429_p2, %p1428_p1 }
   0xf   :  { %p1431_p4 = pnand %p1430_p3, %p1424_p0 }
  0x10   :  { %1198 = vmatmul.mubr.msk.f32.gmra.mrb[2].mxu0 %vm38_vm0, %v24_v9 }
  0x11   :  { %1200 = vmatprep.mubr.msk.f32.mxu0 %vm38_vm0, %v25_v21 }
  0x14   :  { %1201 = vmatmul.mubr.msk.f32.gmra.mrb[4].mxu0 %vm38_vm0, %v26_v22 }
  0xdf   :  { %v1196_v11 = vpop.f32.mrb[0].mxu0 }
  0xe0   :  { %v123_v12 = vpop.f32.mrb[1].mxu0  ;;  %v129_v29 = vadd.f32 %v1196_v11, %v1524_v10 }
  0xe1   :  { %v124_v13 = vadd.f32 %v1524_v10, %v123_v12 }
  0xe3   :  { %v1199_v14 = vpop.f32.mrb[2].mxu0  ;;  %1207 = vmatprep.mubr.msk.f32.mxu1 %vm198_vm1, %v124_v13 }
  0xe4   :  { %v139_v15 = vadd.f32 %v1199_v14, %v1524_v10  ;;  %v133_v16 = vpop.f32.mrb[3].mxu0 }
  0xe5   :  { %v134_v17 = vadd.f32 %v1524_v10, %v133_v16 }
  0xe7   :  { %v1327_v18 = vpack.i.bf16 %v139_v15, %v134_v17  ;;  %v1202_v48 = vpop.f32.mrb[4].mxu0 }
  0xe8   :  { %v143_v49 = vpop.f32.mrb[5].mxu0  ;;  %v149_v50 = vadd.f32 %v1202_v48, %v1524_v10 }
  0xe9   :  { %1328 = vrot.lane.b32.xlu1 %v1327_v18, %s1447_s10  ;;  %1318 = vrot.lane.b32.xlu0 %v1327_v18, %s1448_s11  ;;  %v144_v51 = vadd.f32 %v1524_v10, %v143_v49 }
  0xeb   :  { %v1357_v52 = vpack.i.bf16 %v149_v50, %v144_v51 }
  0xed   :  { %1333 = vrot.lane.b32.xlu1 %v1327_v18, %s1449_s2  ;;  %1323 = vrot.lane.b32.xlu0 %v1327_v18, %s1450_s12 }
 0x15b   :  { %v1329_v19 = vpop.permute.xlu1 %1328  ;;  %v1319_v20 = vpop.permute.xlu0 %1318 }
 0x15c   :  { %1338 = vrot.lane.b32.xlu0 %v1319_v20, %s1449_s2 }
 0x15f   :  { %v1334_v23 = vpop.permute.xlu1 %1333  ;;  %v1324_v24 = vpop.permute.xlu0 %1323 }
 0x160   :  { %v1336_v25 = vunpack.i.h.bf16 %v1334_v23  ;;  %v1335_v26 = vunpack.i.l.bf16 %v1334_v23  ;;  %1343 = vrot.lane.b32.xlu1 %v1324_v24, %s1449_s2  ;;  %1348 = vrot.lane.b32.xlu0 %v1329_v19, %s1449_s2 }
 0x162   :  { %v1267_v28 = vpack.c.bf16 %v1336_v25, %v1335_v26 }
 0x164   :  { %1269 = vmatprep.subr.msk.bf16.mxu1 %vm1543_vm2, %v1267_v28  ;;  %154 = vrot.lane.b32.xlu1 %v124_v13, %s1448_s11 }
 0x165   :  { %1272 = vmatpush3.bf16.xpose.msk.msra.mxu1 %vm1543_vm2, %v1267_v28  ;;  %156 = vrot.lane.b32.xlu0 %v129_v29, %s1448_s11 }
 0x168   :  { %158 = vrot.lane.b32.xlu1 %v124_v13, %s1450_s12 }
 0x169   :  { %160 = vrot.lane.b32.xlu0 %v129_v29, %s1450_s12 }
 0x16c   :  { %1208 = vmatmul.mubr.msk.f32.vlgmr.msra.gmra.mrb[0].mxu1 %vm198_vm1, %v129_v29  ;;  %162 = vrot.lane.b32.xlu1 %v124_v13, %s1447_s10 }
 0x16d   :  { %164 = vrot.lane.b32.xlu0 %v129_v29, %s1447_s10 }
 0x1ce   :  { %v1339_v30 = vpop.permute.xlu0 %1338 }
 0x1cf   :  { %v1341_v31 = vunpack.i.h.bf16 %v1339_v30  ;;  %v1340_v32 = vunpack.i.l.bf16 %v1339_v30 }
 0x1d1   :  { %v1273_v33 = vpack.c.bf16 %v1341_v31, %v1340_v32 }
 0x1d2   :  { %v1344_v34 = vpop.permute.xlu1 %1343  ;;  %v1349_v37 = vpop.permute.xlu0 %1348 }
 0x1d3   :  { %v1346_v35 = vunpack.i.h.bf16 %v1344_v34  ;;  %v1345_v36 = vunpack.i.l.bf16 %v1344_v34  ;;  %1275 = vmatprep.subr.msk.bf16.mxu1 %vm1543_vm2, %v1273_v33  ;;  %v1351_v38 = vunpack.i.h.bf16 %v1349_v37  ;;  %v1350_v39 = vunpack.i.l.bf16 %v1349_v37 }
 0x1d4   :  { %1278 = vmatpush3.bf16.xpose.msk.msra.mxu1 %vm1543_vm2, %v1273_v33 }
 0x1d5   :  { %v1279_v40 = vpack.c.bf16 %v1346_v35, %v1345_v36  ;;  %v1285_v41 = vpack.c.bf16 %v1351_v38, %v1350_v39 }
 0x1d6   :  { %v155_v42 = vpop.permute.xlu1 %154 }
 0x1d7   :  { %v157_v43 = vpop.permute.xlu0 %156  ;;  %1214 = vmatprep.mubr.msk.f32.mxu1 %vm198_vm1, %v155_v42  ;;  %1281 = vmatprep.subr.msk.bf16.mxu0 %vm1543_vm2, %v1279_v40 }
 0x1d8   :  { %1287 = vmatprep.subr.msk.bf16.mxu1 %vm1543_vm2, %v1285_v41  ;;  %1284 = vmatpush3.bf16.xpose.msk.msra.mxu0 %vm1543_vm2, %v1279_v40 }
 0x1da   :  { %v159_v44 = vpop.permute.xlu1 %158 }
 0x1db   :  { %1215 = vmatmul.mubr.msk.f32.vlgmr.msra.gmra.mrb[2].mxu1 %vm198_vm1, %v157_v43  ;;  %1221 = vmatprep.mubr.msk.f32.mxu0 %vm198_vm1, %v159_v44  ;;  %v161_v45 = vpop.permute.xlu0 %160 }
 0x1dc   :  { %1290 = vmatpush3.bf16.xpose.msk.msra.mxu1 %vm1543_vm2, %v1285_v41 }
 0x1de   :  { %v163_v46 = vpop.permute.xlu1 %162 }
 0x1df   :  { %1222 = vmatmul.mubr.msk.f32.vlgmr.msra.gmra.mrb[6].mxu0 %vm198_vm1, %v161_v45  ;;  %1228 = vmatprep.mubr.msk.f32.mxu1 %vm198_vm1, %v163_v46  ;;  %v165_v47 = vpop.permute.xlu0 %164 }
 0x1e3   :  { %1229 = vmatmul.mubr.msk.f32.vlgmr.msra.gmra.mrb[4].mxu1 %vm198_vm1, %v165_v47 }
 0x23f   :  { %v1209_v53 = vpop.f32.mrb[0].mxu1 }
 0x240   :  { %v544_v55 = vmul.f32 0.35355338, %v1209_v53  ;;  %v273_v56 = vpop.f32.mrb[1].mxu1 }
 0x241   :  { %v543_v58 = vmul.f32 0.35355338, %v273_v56 }
 0x242   :  { %v554_v59 = vadd.f32 %v552_v54, %v544_v55 }
 0x243   :  { %v553_v60 = vadd.f32 %v551_v57, %v543_v58 }
 0x244   :  { %v565_v61 = vsel %vm561_vm3, %v554_v59, -inf }
 0x245   :  { %566 = vmax.xlane.f32.xlu0 %v565_v61  ;;  %v562_v62 = vsel %vm561_vm3, %v553_v60, -inf }
 0x246   :  { %563 = vmax.xlane.f32.xlu1 %v562_v62 }
 0x2ae   :  { %v1216_v63 = vpop.f32.mrb[2].mxu1 }
 0x2af   :  { %v546_v0 = vmul.f32 0.35355338, %v1216_v63  ;;  %v360_v1 = vpop.f32.mrb[3].mxu1 }
 0x2b0   :  { %v545_v2 = vmul.f32 0.35355338, %v360_v1 }
 0x2b1   :  { %v556_v3 = vadd.f32 %v552_v54, %v546_v0 }
 0x2b2   :  { %v1223_v4 = vpop.f32.mrb[6].mxu0  ;;  %v555_v6 = vadd.f32 %v551_v57, %v545_v2 }
 0x2b3   :  { %v548_v8 = vmul.f32 0.35355338, %v1223_v4  ;;  %v447_v9 = vpop.f32.mrb[7].mxu0  ;;  %v571_v10 = vsel %vm561_vm3, %v556_v3, -inf }
 0x2b4   :  { %v547_v11 = vmul.f32 0.35355338, %v447_v9  ;;  %572 = vmax.xlane.f32.xlu1 %v571_v10  ;;  %v568_v12 = vsel %vm561_vm3, %v555_v6, -inf }
 0x2b5   :  { %569 = vmax.xlane.f32.xlu0 %v568_v12  ;;  %v558_v13 = vadd.f32 %v552_v54, %v548_v8 }
 0x2b6   :  { %v1230_v14 = vpop.f32.mrb[4].mxu1  ;;  %v557_v15 = vadd.f32 %v551_v57, %v547_v11 }
 0x2b7   :  { %v550_v16 = vmul.f32 0.35355338, %v1230_v14  ;;  %v534_v17 = vpop.f32.mrb[5].mxu1  ;;  %v577_v18 = vsel %vm561_vm3, %v558_v13, -inf }
 0x2b8   :  { %v549_v19 = vmul.f32 0.35355338, %v534_v17  ;;  %578 = vmax.xlane.f32.xlu1 %v577_v18  ;;  %v574_v20 = vsel %vm561_vm3, %v557_v15, -inf }
 0x2b9   :  { %575 = vmax.xlane.f32.xlu0 %v574_v20  ;;  %v560_v21 = vadd.f32 %v552_v54, %v550_v16 }
 0x2ba   :  { %v1591_v22 = vadd.f32 %v551_v57, %v549_v19 }
 0x2bb   :  { %v583_v23 = vsel %vm561_vm3, %v560_v21, -inf }
 0x2bc   :  { %584 = vmax.xlane.f32.xlu1 %v583_v23  ;;  %v580_v24 = vsel %vm561_vm3, %v1591_v22, -inf }
 0x2bd   :  { %581 = vmax.xlane.f32.xlu0 %v580_v24 }
 0x2cd   :  { %1358 = vrot.lane.b32.xlu1 %v1357_v52, %s1450_s12 }
 0x2d1   :  { %1363 = vrot.lane.b32.xlu1 %v1357_v52, %s1447_s10 }
 0x2d2   :  { %v567_v27 = vpop.xlane.xlu0 %566 }
 0x2d3   :  { %1353 = vrot.lane.b32.xlu0 %v1357_v52, %s1448_s11  ;;  %v564_v25 = vpop.xlane.xlu1 %563  ;;  %v587_v29 = vsub.f32 %v554_v59, %v567_v27 }
 0x2d4   :  { %v586_v26 = vsub.f32 %v553_v60, %v564_v25 }
 0x2d5   :  { %1368 = vrot.lane.b32.xlu1 %v1357_v52, %s1451_s4  ;;  %v596_v30 = vmul.f32 1.442695, %v587_v29 }
 0x2d6   :  { %v594_v28 = vmul.f32 1.442695, %v586_v26 }
 0x2d8   :  { %1387 = vpow2.f32 %v594_v28 }
 0x2d9   :  { %1389 = vpow2.f32 %v596_v30 }
 0x2e2   :  { %v1600_v31 = vpop.eup %1387 }
 0x2e3   :  { %v610_v32 = vsel %vm561_vm3, %v1600_v31, 0.0  ;;  %v1604_v33 = vpop.eup %1389 }
 0x2e4   :  { %v613_v34 = vsel %vm561_vm3, %v1604_v33, 0.0 }
 0x2f2   :  { %611 = vadd.xlane.f32.xlu0 %v610_v32 }
 0x2f9   :  { %614 = vadd.xlane.f32.xlu1 %v613_v34 }
 0x341   :  { %v573_v35 = vpop.xlane.xlu1 %572 }
 0x342   :  { %v589_v36 = vsub.f32 %v556_v3, %v573_v35  ;;  %v570_v37 = vpop.xlane.xlu0 %569 }
 0x343   :  { %v588_v39 = vsub.f32 %v555_v6, %v570_v37 }
 0x344   :  { %v600_v38 = vmul.f32 1.442695, %v589_v36 }
 0x345   :  { %v579_v40 = vpop.xlane.xlu1 %578  ;;  %v598_v44 = vmul.f32 1.442695, %v588_v39 }
 0x346   :  { %1391 = vpow2.f32 %v600_v38  ;;  %v591_v41 = vsub.f32 %v558_v13, %v579_v40  ;;  %v576_v42 = vpop.xlane.xlu0 %575 }
 0x347   :  { %v590_v43 = vsub.f32 %v557_v15, %v576_v42 }
 0x348   :  { %v604_v45 = vmul.f32 1.442695, %v591_v41 }
 0x349   :  { %v602_v46 = vmul.f32 1.442695, %v590_v43  ;;  %v585_v47 = vpop.xlane.xlu1 %584 }
 0x34a   :  { %1393 = vpow2.f32 %v604_v45  ;;  %v593_v48 = vsub.f32 %v560_v21, %v585_v47  ;;  %v582_v2 = vpop.xlane.xlu0 %581 }
 0x34b   :  { %1395 = vpow2.f32 %v602_v46  ;;  %v592_v4 = vsub.f32 %v1591_v22, %v582_v2 }
 0x34c   :  { %1397 = vpow2.f32 %v598_v44  ;;  %v608_v49 = vmul.f32 1.442695, %v593_v48 }
 0x34d   :  { %v1359_v50 = vpop.permute.xlu1 %1358  ;;  %v606_v6 = vmul.f32 1.442695, %v592_v4 }
 0x34e   :  { %1399 = vpow2.f32 %v608_v49  ;;  %v1354_v3 = vpop.permute.xlu0 %1353 }
 0x34f   :  { %1401 = vpow2.f32 %v606_v6 }
 0x350   :  { %v1608_v51 = vpop.eup %1391 }
 0x351   :  { %v1364_v52 = vpop.permute.xlu1 %1363  ;;  %v619_v53 = vsel %vm561_vm3, %v1608_v51, 0.0 }
 0x352   :  { %620 = vadd.xlane.f32.xlu0 %v619_v53 }
 0x354   :  { %v1612_v54 = vpop.eup %1393 }
 0x355   :  { %v1614_v55 = vpop.eup %1395  ;;  %v1369_v56 = vpop.permute.xlu1 %1368  ;;  %v625_v57 = vsel %vm561_vm3, %v1612_v54, 0.0 }
 0x356   :  { %v1618_v58 = vpop.eup %1397  ;;  %v1371_v59 = vunpack.i.h.bf16 %v1369_v56  ;;  %v1370_v60 = vunpack.i.l.bf16 %v1369_v56  ;;  %626 = vadd.xlane.f32.xlu0 %v625_v57  ;;  %v622_v61 = vsel %vm561_vm3, %v1614_v55, 0.0 }
 0x357   :  { %623 = vadd.xlane.f32.xlu1 %v622_v61  ;;  %v616_v63 = vsel %vm561_vm3, %v1618_v58, 0.0 }
 0x358   :  { %v1291_v62 = vpack.c.bf16 %v1371_v59, %v1370_v60  ;;  %v1624_v0 = vpop.eup %1399 }
 0x359   :  { %v631_v1 = vsel %vm561_vm3, %v1624_v0, 0.0  ;;  %v1631_v10 = vpop.eup %1401 }
 0x35a   :  { %1292 = vmatprep.subr.bf16.mxu0 %v1291_v62  ;;  %617 = vadd.xlane.f32.xlu0 %v616_v63  ;;  %v628_v13 = vsel %vm561_vm3, %v1631_v10, 0.0 }
 0x35b   :  { %1294 = vmatpush3.bf16.msra.mxu0 %v1291_v62 }
 0x35e   :  { %632 = vadd.xlane.f32.xlu0 %v631_v1 }
 0x368   :  { %1378 = vrot.lane.b32.xlu1 %v1359_v50, %s1451_s4 }
 0x374   :  { %1373 = vrot.lane.b32.xlu0 %v1354_v3, %s1451_s4 }
 0x37f   :  { %v612_v8 = vpop.xlane.xlu0 %611 }
 0x380   :  { %1403 = vrcp.f32 %v612_v8 }
 0x386   :  { %v615_v9 = vpop.xlane.xlu1 %614 }
 0x387   :  { %1405 = vrcp.f32 %v615_v9 }
 0x38a   :  { %v1404_v11 = vpop.eup %1403 }
 0x38b   :  { %v642_v12 = vmul.f32 %v1404_v11, %v612_v8 }
 0x38c   :  { %629 = vadd.xlane.f32.xlu1 %v628_v13 }
 0x38d   :  { %v650_v14 = vsub.f32 2.0, %v642_v12 }
 0x38f   :  { %v658_v15 = vmul.f32 %v1404_v11, %v650_v14 }
 0x391   :  { %v1406_v16 = vpop.eup %1405  ;;  %v666_v17 = vmul.f32 %v1600_v31, %v658_v15 }
 0x392   :  { %v643_v18 = vmul.f32 %v1406_v16, %v615_v9 }
 0x393   :  { %1235 = vmatprep.mubr.msk.f32.mxu0 %vm561_vm3, %v666_v17 }
 0x394   :  { %v651_v19 = vsub.f32 2.0, %v643_v18 }
 0x396   :  { %v659_v20 = vmul.f32 %v1406_v16, %v651_v19 }
 0x398   :  { %v667_v21 = vmul.f32 %v1604_v33, %v659_v20 }
 0x39a   :  { %1236 = vmatmul.mubr.msk.f32.vlgmr.msra.gmra.mrb[8].mxu0 %vm561_vm3, %v667_v21 }
 0x39d   :  { %1383 = vrot.lane.b32.xlu1 %v1364_v52, %s1451_s4 }
 0x3df   :  { %v621_v22 = vpop.xlane.xlu0 %620 }
 0x3e0   :  { %1407 = vrcp.f32 %v621_v22 }
 0x3e3   :  { %v627_v23 = vpop.xlane.xlu0 %626 }
 0x3e4   :  { %1409 = vrcp.f32 %v627_v23  ;;  %v624_v24 = vpop.xlane.xlu1 %623 }
 0x3e5   :  { %1411 = vrcp.f32 %v624_v24 }
 0x3e7   :  { %v618_v25 = vpop.xlane.xlu0 %617 }
 0x3e8   :  { %1413 = vrcp.f32 %v618_v25  ;;  %v1379_v26 = vpop.permute.xlu1 %1378 }
 0x3e9   :  { %v1381_v27 = vunpack.i.h.bf16 %v1379_v26  ;;  %v1380_v28 = vunpack.i.l.bf16 %v1379_v26 }
 0x3ea   :  { %v1408_v29 = vpop.eup %1407 }
 0x3eb   :  { %v1299_v30 = vpack.c.bf16 %v1381_v27, %v1380_v28  ;;  %v633_v31 = vpop.xlane.xlu0 %632  ;;  %v645_v33 = vmul.f32 %v1408_v29, %v621_v22 }
 0x3ec   :  { %1415 = vrcp.f32 %v633_v31 }
 0x3ed   :  { %1300 = vmatprep.subr.bf16.mxu1 %v1299_v30  ;;  %v653_v42 = vsub.f32 2.0, %v645_v33 }
 0x3ee   :  { %v1410_v32 = vpop.eup %1409  ;;  %1302 = vmatpush3.bf16.msra.mxu1 %v1299_v30 }
 0x3ef   :  { %v1412_v34 = vpop.eup %1411  ;;  %v647_v35 = vmul.f32 %v1410_v32, %v627_v23  ;;  %v1374_v36 = vpop.permute.xlu0 %1373  ;;  %v661_v49 = vmul.f32 %v1408_v29, %v653_v42  ;;  %v1083_v42 = vlaneseq }
 0x3f0   :  { %v646_v37 = vmul.f32 %v1412_v34, %v624_v24  ;;  %v1376_v38 = vunpack.i.h.bf16 %v1374_v36  ;;  %v1375_v39 = vunpack.i.l.bf16 %v1374_v36 }
 0x3f1   :  { %v655_v40 = vsub.f32 2.0, %v647_v35  ;;  %v669_v57 = vmul.f32 %v1608_v51, %v661_v49  ;;  %v1082_v49 = vld [vmem:[%s1685_s3] sm:$0x3] }
 0x3f2   :  { %v1414_v41 = vpop.eup %1413  ;;  %v654_v43 = vsub.f32 2.0, %v646_v37  ;;  %v1295_v44 = vpack.c.bf16 %v1376_v38, %v1375_v39 }
 0x3f3   :  { %v663_v45 = vmul.f32 %v1410_v32, %v655_v40  ;;  %v644_v46 = vmul.f32 %v1414_v41, %v618_v25 }
 0x3f4   :  { %v662_v47 = vmul.f32 %v1412_v34, %v654_v43  ;;  %1296 = vmatprep.subr.bf16.mxu0 %v1295_v44 }
 0x3f5   :  { %v652_v48 = vsub.f32 2.0, %v644_v46  ;;  %1298 = vmatpush3.bf16.msra.mxu0 %v1295_v44  ;;  %v671_v52 = vmul.f32 %v1612_v54, %v663_v45  ;;  %v1084_v46 = vshrl.u32 %v1083_v42, 7 }
 0x3f6   :  { %v670_v50 = vmul.f32 %v1614_v55, %v662_v47  ;;  %v1416_v60 = vpop.eup %1415 }
 0x3f7   :  { %v660_v53 = vmul.f32 %v1414_v41, %v652_v48  ;;  %v649_v62 = vmul.f32 %v1416_v60, %v633_v31  ;;  %v1085_v48 = vsub.s32 0, %v1084_v46 }
 0x3f8   :  { %1249 = vmatprep.mubr.msk.f32.mxu1 %vm561_vm3, %v670_v50  ;;  %v1091_v50 = vsub.s32 1, %v1084_v46 }
 0x3f9   :  { %v668_v56 = vmul.f32 %v1618_v58, %v660_v53  ;;  %1250 = vmatmul.mubr.msk.f32.vlgmr.msra.gmra.mrb[6].mxu1 %vm561_vm3, %v671_v52  ;;  %v657_v1 = vsub.f32 2.0, %v649_v62  ;;  %v1086_v52 = vrot.slane %v1082_v49, %v1085_v48 }
 0x3fb   :  { %1242 = vmatprep.mubr.msk.f32.mxu0 %vm561_vm3, %v668_v56  ;;  %v665_v51 = vmul.f32 %v1416_v60, %v657_v1 }
 0x3fc   :  { %1243 = vmatmul.mubr.msk.f32.vlgmr.msra.gmra.mrb[10].mxu0 %vm561_vm3, %v669_v57  ;;  %v1092_v57 = vrot.slane %v1082_v49, %v1091_v50 }
 0x3fd   :  { %v673_v8 = vmul.f32 %v1624_v0, %v665_v51 }
 0x419   :  { %v630_v59 = vpop.xlane.xlu1 %629 }
 0x41a   :  { %1417 = vrcp.f32 %v630_v59 }
 0x41d   :  { %v1384_v55 = vpop.permute.xlu1 %1383 }
 0x41e   :  { %v1386_v61 = vunpack.i.h.bf16 %v1384_v55  ;;  %v1385_v54 = vunpack.i.l.bf16 %v1384_v55 }
 0x420   :  { %v1303_v63 = vpack.c.bf16 %v1386_v61, %v1385_v54 }
 0x422   :  { %1304 = vmatprep.subr.bf16.mxu0 %v1303_v63 }
 0x423   :  { %1306 = vmatpush3.bf16.msra.mxu0 %v1303_v63 }
 0x424   :  { %v1418_v58 = vpop.eup %1417 }
 0x425   :  { %v648_v2 = vmul.f32 %v1418_v58, %v630_v59 }
 0x427   :  { %v656_v3 = vsub.f32 2.0, %v648_v2 }
 0x429   :  { %v664_v4 = vmul.f32 %v1418_v58, %v656_v3 }
 0x42b   :  { %v672_v6 = vmul.f32 %v1631_v10, %v664_v4 }
 0x42d   :  { %1256 = vmatprep.mubr.msk.f32.mxu0 %vm561_vm3, %v672_v6 }
 0x42e   :  { %1257 = vmatmul.mubr.msk.f32.vlgmr.msra.gmra.mrb[12].mxu0 %vm561_vm3, %v673_v8 }
 0x46d   :  { %v1237_v9 = vpop.f32.mrb[8].mxu0 }
 0x46e   :  { %v752_v11 = vpop.f32.mrb[9].mxu0 }
 0x4cc   :  { %v1251_v12 = vpop.f32.mrb[6].mxu1 }
 0x4cd   :  { %v926_v13 = vpop.f32.mrb[7].mxu1 }
 0x4cf   :  { %v1244_v14 = vpop.f32.mrb[10].mxu0 }
 0x4d0   :  { %1026 = vrot.lane.b32.xlu1 %v1244_v14, %s1452_s20  ;;  %v839_v15 = vpop.f32.mrb[11].mxu0 }
 0x4d1   :  { %1024 = vrot.lane.b32.xlu0 %v839_v15, %s1452_s20 }
 0x4d4   :  { %1034 = vrot.lane.b32.xlu1 %v1251_v12, %s1453_s21 }
 0x4d5   :  { %1032 = vrot.lane.b32.xlu0 %v926_v13, %s1453_s21 }
 0x501   :  { %v1258_v10 = vpop.f32.mrb[12].mxu0 }
 0x502   :  { %1042 = vrot.lane.b32.xlu1 %v1258_v10, %s1454_s22  ;;  %v1013_v0 = vpop.f32.mrb[13].mxu0 }
 0x503   :  { %1040 = vrot.lane.b32.xlu0 %v1013_v0, %s1454_s22 }
 0x542   :  { %v1027_v16 = vpop.permute.xlu1 %1026 }
 0x543   :  { %v1025_v17 = vpop.permute.xlu0 %1024  ;;  %v1047_v20 = vsel %vm198_vm1, %v1237_v9, %v1027_v16 }
 0x544   :  { %v1046_v21 = vsel %vm198_vm1, %v752_v11, %v1025_v17 }
 0x546   :  { %v1035_v18 = vpop.permute.xlu1 %1034 }
 0x547   :  { %v1033_v19 = vpop.permute.xlu0 %1032  ;;  %v1049_v22 = vsel %vm561_vm3, %v1047_v20, %v1035_v18 }
 0x548   :  { %v1048_v24 = vsel %vm561_vm3, %v1046_v21, %v1033_v19 }
 0x574   :  { %v1043_v23 = vpop.permute.xlu1 %1042 }
 0x575   :  { %v1052_v25 = vsel %vm1050_vm4, %v1049_v22, %v1043_v23  ;;  %v1041_v26 = vpop.permute.xlu0 %1040 }
 0x576   :  { %v1051_v27 = vsel %vm1050_vm4, %v1048_v24, %v1041_v26  ;;  %v1054_v28 = vadd.f32 %v1052_v25, %v1509_v7 }
 0x577   :  { %v1053_v29 = vadd.f32 %v1051_v27, %v1502_v5 }
 0x578   :  { %v1058_v30 = vsel %vm38_vm0, %v1054_v28, 0.0 }
 0x579   :  { %1059 = vadd.xlane.f32.xlu1 %v1058_v30  ;;  %v1055_v31 = vsel %vm38_vm0, %v1053_v29, 0.0 }
 0x57a   :  { %1056 = vadd.xlane.f32.xlu0 %v1055_v31 }
 0x606   :  { %v1060_v32 = vpop.xlane.xlu1 %1059 }
 0x607   :  { %v1063_v33 = vmul.f32 0.03125, %v1060_v32  ;;  %v1057_v34 = vpop.xlane.xlu0 %1056 }
 0x608   :  { %v1062_v35 = vmul.f32 0.03125, %v1057_v34 }
 0x609   :  { %v1065_v36 = vsub.f32 %v1054_v28, %v1063_v33 }
 0x60a   :  { %v1064_v37 = vsub.f32 %v1053_v29, %v1062_v35 }
 0x60b   :  { %v1067_v40 = vmul.f32 %v1065_v36, %v1065_v36 }
 0x60c   :  { %v1066_v38 = vmul.f32 %v1064_v37, %v1064_v37 }
 0x60d   :  { %v1071_v7 = vsel %vm38_vm0, %v1067_v40, 0.0 }
 0x60e   :  { %v1068_v39 = vsel %vm38_vm0, %v1066_v38, 0.0 }
 0x60f   :  { %1069 = vadd.xlane.f32.xlu0 %v1068_v39 }
 0x613   :  { %1072 = vadd.xlane.f32.xlu0 %v1071_v7 }
 0x69c   :  { %v1070_v5 = vpop.xlane.xlu0 %1069 }
 0x69d   :  { %v1074_v41 = vmul.f32 0.03125, %v1070_v5 }
 0x69f   :  { %v1076_v43 = vadd.f32 1e-06, %v1074_v41 }
 0x6a0   :  { %v1073_v44 = vpop.xlane.xlu0 %1072 }
 0x6a1   :  { %1419 = vrsqrt.f32 %v1076_v43  ;;  %v1075_v45 = vmul.f32 0.03125, %v1073_v44 }
 0x6a3   :  { %v1077_v47 = vadd.f32 1e-06, %v1075_v45 }
 0x6a5   :  { %1421 = vrsqrt.f32 %v1077_v47 }
 0x6ab   :  { %v1420_v53 = vpop.eup %1419 }
 0x6ac   :  { %v1080_v56 = vmul.f32 %v1420_v53, %v1064_v37 }
 0x6ae   :  { %v1087_v59 = vmul.f32 %v1086_v52, %v1080_v56 }
 0x6af   :  { %v1422_v60 = vpop.eup %1421 }
 0x6b0   :  { %v1081_v55 = vmul.f32 %v1422_v60, %v1065_v36  ;;  %v1093_v61 = vadd.f32 %v1092_v57, %v1087_v59 }
 0x6b2   :  { %v1088_v54 = vmul.f32 %v1086_v52, %v1081_v55  ;;  %1095 = vst.msk [vmem:[#allocation2] sm:$0xff] %vm38_vm0, %v1093_v61 }
 0x6b4   :  { %v1094_v62 = vadd.f32 %v1092_v57, %v1088_v54 }
 0x6b6   :  { %1096 = vst.msk [vmem:[#allocation2 + $0x8] sm:$0xff] %vm38_vm0, %v1094_v62 }
 0x6b7   :  { %1434 = shalt.err (!%p1431_p4)
}
 0x6b8   :  { %s1435_s29 = scalar_lea.hbm %s1687_s5, 256 }
 0x6b9   :  { %p1436_p5 = scmp.ne.s32.totalorder %s1687_s5, %s1435_s29  ;;  %p1439_p6 = scmp.lt.u32.totalorder %s1435_s29, %s1687_s5 }
 0x6bb   :  { %p1441_p7 = pnand %p1439_p6, %p1436_p5 }
 0x6bd   :  { %1444 = shalt.err (!%p1441_p7)
}
 0x6be   :  { %s1456_s8 = smov 128  }
 0x6bf   :  { %1108 = dma.vmem_to_hbm [thread:$0]  %s1103_s26, 256, %s1687_s5, [#allocation3], %s1456_s8, %s1456_s8, %s1452_s20  }
 0x6c0   :  { %1445 = dma.done.wait [#allocation3], 256  }
 0x6c1   :  { %1446 = vsyncadd [#allocation3], 4294967040 }
 0x6c2   :  { %1112 = vsyncpa [#allocation3], 1 }

</bundles_post_ra>
